<compile_context>
chip_gen: v7x
topology: tpu7x:2x2x1
jax: 0.10.0
libtpu: 0.0.40
codegen_flags: <defaults>
</compile_context>

<pallas_src>
import functools

import jax
import jax.numpy as jnp
from jax.experimental import pallas as pl
from jax.experimental.pallas import tpu as pltpu


def _round_up(x, m):
    return (x + m - 1) // m * m


def _pick_tile_m(m_total, min_tile, max_tile=1024, min_steps=8):
    """Largest multiple-of-128 tile <= max_tile that still yields >= min_steps
    grid steps, but never below min_tile (halo constraint: tile_m >= max tap
    offset so the i / i+1 block pair always covers every shifted window)."""
    lo = _round_up(max(min_tile, 128), 128)
    hi = max(_round_up(max_tile, 128), lo)
    tile = hi
    while tile - 128 >= lo and pl.cdiv(m_total, tile) < min_steps:
        tile -= 128
    return tile


def _shiftgemm_bn_relu_kernel(a_ref, b_ref, w_ref, bias_ref, o_ref, *,
                              offsets, tile_m):
    # a_ref   : (C_p, tile_m)         activation columns of tile i
    # b_ref   : (C_p, tile_m)         activation columns of tile i+1 (halo)
    # w_ref   : (taps, Cout_p, C_p)   BN-scale-folded transposed weights
    #                                 (single VMEM-resident copy)
    # bias_ref: (Cout_p, 1)           folded BN bias, f32 (VMEM-resident)
    # o_ref   : (Cout_p, tile_m)      output tile (lane-dense stores)
    slab = jnp.concatenate([a_ref[...], b_ref[...]], axis=1)  # (C_p, 2*tile_m)
    acc = None
    for t, off in enumerate(offsets):
        # Static column shift: tap t of the 3x3x3 stencil is the flattened
        # padded volume shifted by `off` columns (off <= tile_m by design).
        xt = slab[:, off:off + tile_m]                         # (C_p, tile_m)
        part = jnp.dot(w_ref[t], xt, preferred_element_type=jnp.float32)
        acc = part if acc is None else acc + part
    o_ref[...] = jnp.maximum(acc + bias_ref[...], 0.0).astype(o_ref.dtype)


def basic_convolution_block(x_ncdhw, weight, gamma, beta, running_mean,
                            running_var, *, ks=3, stride=1, dilation=1,
                            eps=1e-5, compute_dtype=jnp.bfloat16,
                            out_dtype=jnp.float32, tile_m_max=1024):
    """Dense-voxel equivalent of torchsparse BasicConvolutionBlock forward.

    x_ncdhw: (N, C_in, D, H, W) float32
    weight:  (ks, ks, ks, C_in, C_out) float32  (no bias, as in spnn.Conv3d)
    BatchNorm is applied with the supplied running statistics (eval mode).
    """
    assert stride == 1, "dense equivalent implemented for stride=1 (default)"
    assert ks % 2 == 1, "centered ('same') padding implemented for odd ks"
    N, C_in, D, H, W = x_ncdhw.shape
    C_out = weight.shape[-1]
    n_taps = ks * ks * ks
    p = dilation * (ks // 2)
    Dp, Hp, Wp = D + 2 * p, H + 2 * p, W + 2 * p
    P = Dp * Hp * Wp
    M = N * P                                   # flattened padded positions

    # Column offset of each stencil tap inside the flattened padded volume.
    offsets = tuple(dilation * (kd * Hp * Wp + kh * Wp + kw)
                    for kd in range(ks) for kh in range(ks) for kw in range(ks))
    max_off = max(offsets)

    tile_m = _pick_tile_m(M, min_tile=max_off, max_tile=tile_m_max)
    assert tile_m >= max_off
    m_tiles = pl.cdiv(M, tile_m)
    M_main = m_tiles * tile_m
    M_cols = M_main + tile_m                    # +1 zero tile feeding the halo

    C_p = _round_up(C_in, 8)
    C_out_p = _round_up(C_out, 8)

    # Channel-major flattening: the input is already NCDHW, so only spatial
    # zero-padding + reshape + a single zero pad of the tail columns/channels
    # (no 27x im2col expansion, no full-size second pad copy).
    x_pad = jnp.pad(x_ncdhw, ((0, 0), (0, 0), (p, p), (p, p), (p, p)))
    xf = jnp.transpose(x_pad, (1, 0, 2, 3, 4)).reshape(C_in, M)
    xf = jnp.pad(xf, ((0, C_p - C_in), (0, M_cols - M))).astype(compute_dtype)

    # Fold BatchNorm (eval) scale into the weights; bias stays separate.
    scale = (gamma / jnp.sqrt(running_var + eps)).astype(jnp.float32)
    bias = (beta - running_mean * scale).astype(jnp.float32)
    w_t = weight.reshape(n_taps, C_in, C_out).astype(jnp.float32)
    w_t = w_t * scale[None, None, :]
    w_t = jnp.transpose(w_t, (0, 2, 1))                       # (taps, Cout, Cin)
    w_t = jnp.pad(w_t, ((0, 0), (0, C_out_p - C_out), (0, C_p - C_in)))
    w_t = w_t.astype(compute_dtype)
    bias_col = jnp.pad(bias, (0, C_out_p - C_out)).reshape(C_out_p, 1)

    kernel = functools.partial(_shiftgemm_bn_relu_kernel,
                               offsets=offsets, tile_m=tile_m)

    # Explicit VMEM budget (double-buffered activation tiles + output tiles +
    # single-copy weights/bias + in-kernel slab), capped for v7x's 64 MiB.
    in_item = jnp.dtype(compute_dtype).itemsize
    out_item = jnp.dtype(out_dtype).itemsize
    vmem_est = (2 * 2 * C_p * tile_m * in_item          # a/b, double-buffered
                + 2 * C_out_p * tile_m * out_item       # output, double-buffered
                + n_taps * C_out_p * C_p * in_item      # weights (single copy)
                + C_out_p * 4                           # bias
                + 2 * C_p * 2 * tile_m * 4)             # slab value + headroom
    vmem_limit = int(min(64 * 2 ** 20, max(32 * 2 ** 20, 4 * vmem_est)))

    out = pl.pallas_call(
        kernel,
        out_shape=jax.ShapeDtypeStruct((C_out_p, M_main), out_dtype),
        grid_spec=pltpu.PrefetchScalarGridSpec(
            num_scalar_prefetch=0,
            grid=(m_tiles,),
            in_specs=[
                # tile i of the flattened activations
                pl.BlockSpec((C_p, tile_m), lambda i: (0, i)),
                # tile i+1 of the same array: supplies the shift halo
                pl.BlockSpec((C_p, tile_m), lambda i: (0, i + 1)),
                # grid-invariant operands: one VMEM-resident copy, not
                # double-buffered (per review: don't 2x-buffer constant blocks)
                pl.BlockSpec(memory_space=pltpu.MemorySpace.VMEM),
                pl.BlockSpec(memory_space=pltpu.MemorySpace.VMEM),
            ],
            out_specs=pl.BlockSpec((C_out_p, tile_m), lambda i: (0, i)),
        ),
        compiler_params=pltpu.CompilerParams(
            dimension_semantics=("parallel",),
            vmem_limit_bytes=vmem_limit),
    )(xf, xf, w_t, bias_col)

    # Valid outputs live at the first D/H/W indices of each padded sub-volume.
    out = out[:C_out, :M].reshape(C_out, N, Dp, Hp, Wp)[:, :, :D, :H, :W]
    return jnp.transpose(out, (1, 0, 2, 3, 4))                # -> NCDHW


def _reference(x_ncdhw, weight, gamma, beta, mean, var, *, dilation=1,
               eps=1e-5, fold_bn=True):
    # Pure-JAX reference at HIGHEST precision.  fold_bn=True uses the exact
    # conv-linearity identity conv(x, w)*s == conv(x, w*s) so the comparison
    # is not polluted by different scale-folding roundings.
    x = jnp.transpose(x_ncdhw, (0, 2, 3, 4, 1))               # NDHWC
    ks = weight.shape[0]
    pad = dilation * (ks // 2)
    scale = gamma / jnp.sqrt(var + eps)
    bias = beta - mean * scale
    w = weight * scale if fold_bn else weight
    y = jax.lax.conv_general_dilated(
        x, w,
        window_strides=(1, 1, 1),
        padding=[(pad, pad)] * 3,
        rhs_dilation=(dilation,) * 3,
        dimension_numbers=("NDHWC", "DHWIO", "NDHWC"),
        precision=jax.lax.Precision.HIGHEST)
    if not fold_bn:
        y = y * scale
    y = jnp.maximum(y + bias, 0.0)
    return jnp.transpose(y, (0, 4, 1, 2, 3))


if __name__ == "__main__":
    # Small shapes consistent with the module: inc=4, outc=8, ks=3, stride=1.
    N, C_in, C_out = 2, 4, 8
    D = H = W = 8
    ks, stride, dilation = 3, 1, 1

    key = jax.random.PRNGKey(0)
    kx, kw, kg, kb, km, kv = jax.random.split(key, 6)

    x = jax.random.normal(kx, (N, C_in, D, H, W), dtype=jnp.float32)
    weight = (jax.random.normal(kw, (ks, ks, ks, C_in, C_out),
                                dtype=jnp.float32) * 0.1)
    gamma = 1.0 + 0.1 * jax.random.normal(kg, (C_out,), dtype=jnp.float32)
    beta = 0.1 * jax.random.normal(kb, (C_out,), dtype=jnp.float32)
    running_mean = 0.1 * jax.random.normal(km, (C_out,), dtype=jnp.float32)
    running_var = jnp.abs(jax.random.normal(kv, (C_out,),
                                            dtype=jnp.float32)) + 0.5

    args = (x, weight, gamma, beta, running_mean, running_var)

    ref_folded = _reference(*args, dilation=dilation, fold_bn=True)
    ref_module = _reference(*args, dilation=dilation, fold_bn=False)

    # f32 operand path (accuracy-oriented).
    fwd_f32 = jax.jit(functools.partial(
        basic_convolution_block, ks=ks, stride=stride, dilation=dilation,
        compute_dtype=jnp.float32, out_dtype=jnp.float32))
    out_f32 = jax.block_until_ready(fwd_f32(*args))

    assert out_f32.shape == (N, C_out, D, H, W)
    # Tolerances cover the worst-case MXU default-precision rounding vs. the
    # HIGHEST-precision XLA reference while still catching real bugs.
    assert jnp.allclose(out_f32, ref_folded, atol=2e-2, rtol=2e-2)
    assert jnp.allclose(out_f32, ref_module, atol=5e-2, rtol=5e-2)

    # bf16 operand + bf16 output path (the performance configuration,
    # f32 accumulation inside the MXU).
    fwd_bf16 = jax.jit(functools.partial(
        basic_convolution_block, ks=ks, stride=stride, dilation=dilation,
        compute_dtype=jnp.bfloat16, out_dtype=jnp.bfloat16))
    out_bf16 = jax.block_until_ready(fwd_bf16(*args))
    assert out_bf16.shape == (N, C_out, D, H, W)
    assert out_bf16.dtype == jnp.bfloat16
    assert jnp.allclose(out_bf16.astype(jnp.float32), ref_folded,
                        atol=1e-1, rtol=1e-1)

    print("KERNEL_OK")
</pallas_src>

<mosaic_0001>
module attributes {stable_mosaic.version = 11 : i64} {
  func.func @_shiftgemm_bn_relu_kernel(%arg0: i32, %arg1: memref<8x256xf32, #tpu.memory_space<vmem>>, %arg2: memref<8x256xf32, #tpu.memory_space<vmem>>, %arg3: memref<27x8x8xf32, #tpu.memory_space<vmem>>, %arg4: memref<8x1xf32, #tpu.memory_space<vmem>>, %arg5: memref<8x256xf32, #tpu.memory_space<vmem>>) attributes {dimension_semantics = [#tpu.dimension_semantics<parallel>], iteration_bounds = array<i64: 8>, scalar_prefetch = 0 : i64, scratch_operands = 0 : i64, tpu.core_type = #tpu.core_type<tc>, window_params = [{transform_indices = @transform_0, window_bounds = array<i64: 8, 256>}, {transform_indices = @transform_1, window_bounds = array<i64: 8, 256>}, {pipeline_mode = #tpu.pipeline_mode<synchronous>, transform_indices = @transform_2, window_bounds = array<i64: 27, 8, 8>}, {pipeline_mode = #tpu.pipeline_mode<synchronous>, transform_indices = @transform_3, window_bounds = array<i64: 8, 1>}, {transform_indices = @transform_4, window_bounds = array<i64: 8, 256>}]} {
    %c0 = arith.constant 0 : index
    %c0_0 = arith.constant 0 : index
    %0 = vector.load %arg1[%c0, %c0_0] : memref<8x256xf32, #tpu.memory_space<vmem>>, vector<8x256xf32>
    %c0_1 = arith.constant 0 : index
    %c0_2 = arith.constant 0 : index
    %1 = vector.load %arg2[%c0_1, %c0_2] : memref<8x256xf32, #tpu.memory_space<vmem>>, vector<8x256xf32>
    %2 = tpu.concatenate %0, %1 in 1 : vector<8x256xf32>, vector<8x256xf32> -> vector<8x512xf32>
    %3 = vector.extract_strided_slice %2 {offsets = [0, 0], sizes = [8, 256], strides = [1, 1]} : vector<8x512xf32> to vector<8x256xf32>
    %c0_3 = arith.constant 0 : index
    %c0_4 = arith.constant 0 : index
    %c0_5 = arith.constant 0 : index
    %4 = vector.load %arg3[%c0_3, %c0_4, %c0_5] : memref<27x8x8xf32, #tpu.memory_space<vmem>>, vector<1x8x8xf32>
    %5 = vector.shape_cast %4 : vector<1x8x8xf32> to vector<8x8xf32>
    %cst = arith.constant dense<0.000000e+00> : vector<8x256xf32>
    %6 = tpu.matmul %5, %3, %cst {dimension_numbers = #tpu.dot_dimension_numbers<[1], [0], [0], [1], [0, 0, 1, 1], [], []>} : vector<8x8xf32>, vector<8x256xf32>, vector<8x256xf32> -> vector<8x256xf32>
    %7 = vector.extract_strided_slice %2 {offsets = [0, 1], sizes = [8, 256], strides = [1, 1]} : vector<8x512xf32> to vector<8x256xf32>
    %c1 = arith.constant 1 : index
    %c0_6 = arith.constant 0 : index
    %c0_7 = arith.constant 0 : index
    %8 = vector.load %arg3[%c1, %c0_6, %c0_7] : memref<27x8x8xf32, #tpu.memory_space<vmem>>, vector<1x8x8xf32>
    %9 = vector.shape_cast %8 : vector<1x8x8xf32> to vector<8x8xf32>
    %cst_8 = arith.constant dense<0.000000e+00> : vector<8x256xf32>
    %10 = tpu.matmul %9, %7, %cst_8 {dimension_numbers = #tpu.dot_dimension_numbers<[1], [0], [0], [1], [0, 0, 1, 1], [], []>} : vector<8x8xf32>, vector<8x256xf32>, vector<8x256xf32> -> vector<8x256xf32>
    %11 = arith.addf %6, %10 : vector<8x256xf32>
    %12 = vector.extract_strided_slice %2 {offsets = [0, 2], sizes = [8, 256], strides = [1, 1]} : vector<8x512xf32> to vector<8x256xf32>
    %c2 = arith.constant 2 : index
    %c0_9 = arith.constant 0 : index
    %c0_10 = arith.constant 0 : index
    %13 = vector.load %arg3[%c2, %c0_9, %c0_10] : memref<27x8x8xf32, #tpu.memory_space<vmem>>, vector<1x8x8xf32>
    %14 = vector.shape_cast %13 : vector<1x8x8xf32> to vector<8x8xf32>
    %cst_11 = arith.constant dense<0.000000e+00> : vector<8x256xf32>
    %15 = tpu.matmul %14, %12, %cst_11 {dimension_numbers = #tpu.dot_dimension_numbers<[1], [0], [0], [1], [0, 0, 1, 1], [], []>} : vector<8x8xf32>, vector<8x256xf32>, vector<8x256xf32> -> vector<8x256xf32>
    %16 = arith.addf %11, %15 : vector<8x256xf32>
    %17 = vector.extract_strided_slice %2 {offsets = [0, 10], sizes = [8, 256], strides = [1, 1]} : vector<8x512xf32> to vector<8x256xf32>
    %c3 = arith.constant 3 : index
    %c0_12 = arith.constant 0 : index
    %c0_13 = arith.constant 0 : index
    %18 = vector.load %arg3[%c3, %c0_12, %c0_13] : memref<27x8x8xf32, #tpu.memory_space<vmem>>, vector<1x8x8xf32>
    %19 = vector.shape_cast %18 : vector<1x8x8xf32> to vector<8x8xf32>
    %cst_14 = arith.constant dense<0.000000e+00> : vector<8x256xf32>
    %20 = tpu.matmul %19, %17, %cst_14 {dimension_numbers = #tpu.dot_dimension_numbers<[1], [0], [0], [1], [0, 0, 1, 1], [], []>} : vector<8x8xf32>, vector<8x256xf32>, vector<8x256xf32> -> vector<8x256xf32>
    %21 = arith.addf %16, %20 : vector<8x256xf32>
    %22 = vector.extract_strided_slice %2 {offsets = [0, 11], sizes = [8, 256], strides = [1, 1]} : vector<8x512xf32> to vector<8x256xf32>
    %c4 = arith.constant 4 : index
    %c0_15 = arith.constant 0 : index
    %c0_16 = arith.constant 0 : index
    %23 = vector.load %arg3[%c4, %c0_15, %c0_16] : memref<27x8x8xf32, #tpu.memory_space<vmem>>, vector<1x8x8xf32>
    %24 = vector.shape_cast %23 : vector<1x8x8xf32> to vector<8x8xf32>
    %cst_17 = arith.constant dense<0.000000e+00> : vector<8x256xf32>
    %25 = tpu.matmul %24, %22, %cst_17 {dimension_numbers = #tpu.dot_dimension_numbers<[1], [0], [0], [1], [0, 0, 1, 1], [], []>} : vector<8x8xf32>, vector<8x256xf32>, vector<8x256xf32> -> vector<8x256xf32>
    %26 = arith.addf %21, %25 : vector<8x256xf32>
    %27 = vector.extract_strided_slice %2 {offsets = [0, 12], sizes = [8, 256], strides = [1, 1]} : vector<8x512xf32> to vector<8x256xf32>
    %c5 = arith.constant 5 : index
    %c0_18 = arith.constant 0 : index
    %c0_19 = arith.constant 0 : index
    %28 = vector.load %arg3[%c5, %c0_18, %c0_19] : memref<27x8x8xf32, #tpu.memory_space<vmem>>, vector<1x8x8xf32>
    %29 = vector.shape_cast %28 : vector<1x8x8xf32> to vector<8x8xf32>
    %cst_20 = arith.constant dense<0.000000e+00> : vector<8x256xf32>
    %30 = tpu.matmul %29, %27, %cst_20 {dimension_numbers = #tpu.dot_dimension_numbers<[1], [0], [0], [1], [0, 0, 1, 1], [], []>} : vector<8x8xf32>, vector<8x256xf32>, vector<8x256xf32> -> vector<8x256xf32>
    %31 = arith.addf %26, %30 : vector<8x256xf32>
    %32 = vector.extract_strided_slice %2 {offsets = [0, 20], sizes = [8, 256], strides = [1, 1]} : vector<8x512xf32> to vector<8x256xf32>
    %c6 = arith.constant 6 : index
    %c0_21 = arith.constant 0 : index
    %c0_22 = arith.constant 0 : index
    %33 = vector.load %arg3[%c6, %c0_21, %c0_22] : memref<27x8x8xf32, #tpu.memory_space<vmem>>, vector<1x8x8xf32>
    %34 = vector.shape_cast %33 : vector<1x8x8xf32> to vector<8x8xf32>
    %cst_23 = arith.constant dense<0.000000e+00> : vector<8x256xf32>
    %35 = tpu.matmul %34, %32, %cst_23 {dimension_numbers = #tpu.dot_dimension_numbers<[1], [0], [0], [1], [0, 0, 1, 1], [], []>} : vector<8x8xf32>, vector<8x256xf32>, vector<8x256xf32> -> vector<8x256xf32>
    %36 = arith.addf %31, %35 : vector<8x256xf32>
    %37 = vector.extract_strided_slice %2 {offsets = [0, 21], sizes = [8, 256], strides = [1, 1]} : vector<8x512xf32> to vector<8x256xf32>
    %c7 = arith.constant 7 : index
    %c0_24 = arith.constant 0 : index
    %c0_25 = arith.constant 0 : index
    %38 = vector.load %arg3[%c7, %c0_24, %c0_25] : memref<27x8x8xf32, #tpu.memory_space<vmem>>, vector<1x8x8xf32>
    %39 = vector.shape_cast %38 : vector<1x8x8xf32> to vector<8x8xf32>
    %cst_26 = arith.constant dense<0.000000e+00> : vector<8x256xf32>
    %40 = tpu.matmul %39, %37, %cst_26 {dimension_numbers = #tpu.dot_dimension_numbers<[1], [0], [0], [1], [0, 0, 1, 1], [], []>} : vector<8x8xf32>, vector<8x256xf32>, vector<8x256xf32> -> vector<8x256xf32>
    %41 = arith.addf %36, %40 : vector<8x256xf32>
    %42 = vector.extract_strided_slice %2 {offsets = [0, 22], sizes = [8, 256], strides = [1, 1]} : vector<8x512xf32> to vector<8x256xf32>
    %c8 = arith.constant 8 : index
    %c0_27 = arith.constant 0 : index
    %c0_28 = arith.constant 0 : index
    %43 = vector.load %arg3[%c8, %c0_27, %c0_28] : memref<27x8x8xf32, #tpu.memory_space<vmem>>, vector<1x8x8xf32>
    %44 = vector.shape_cast %43 : vector<1x8x8xf32> to vector<8x8xf32>
    %cst_29 = arith.constant dense<0.000000e+00> : vector<8x256xf32>
    %45 = tpu.matmul %44, %42, %cst_29 {dimension_numbers = #tpu.dot_dimension_numbers<[1], [0], [0], [1], [0, 0, 1, 1], [], []>} : vector<8x8xf32>, vector<8x256xf32>, vector<8x256xf32> -> vector<8x256xf32>
    %46 = arith.addf %41, %45 : vector<8x256xf32>
    %47 = vector.extract_strided_slice %2 {offsets = [0, 100], sizes = [8, 256], strides = [1, 1]} : vector<8x512xf32> to vector<8x256xf32>
    %c9 = arith.constant 9 : index
    %c0_30 = arith.constant 0 : index
    %c0_31 = arith.constant 0 : index
    %48 = vector.load %arg3[%c9, %c0_30, %c0_31] : memref<27x8x8xf32, #tpu.memory_space<vmem>>, vector<1x8x8xf32>
    %49 = vector.shape_cast %48 : vector<1x8x8xf32> to vector<8x8xf32>
    %cst_32 = arith.constant dense<0.000000e+00> : vector<8x256xf32>
    %50 = tpu.matmul %49, %47, %cst_32 {dimension_numbers = #tpu.dot_dimension_numbers<[1], [0], [0], [1], [0, 0, 1, 1], [], []>} : vector<8x8xf32>, vector<8x256xf32>, vector<8x256xf32> -> vector<8x256xf32>
    %51 = arith.addf %46, %50 : vector<8x256xf32>
    %52 = vector.extract_strided_slice %2 {offsets = [0, 101], sizes = [8, 256], strides = [1, 1]} : vector<8x512xf32> to vector<8x256xf32>
    %c10 = arith.constant 10 : index
    %c0_33 = arith.constant 0 : index
    %c0_34 = arith.constant 0 : index
    %53 = vector.load %arg3[%c10, %c0_33, %c0_34] : memref<27x8x8xf32, #tpu.memory_space<vmem>>, vector<1x8x8xf32>
    %54 = vector.shape_cast %53 : vector<1x8x8xf32> to vector<8x8xf32>
    %cst_35 = arith.constant dense<0.000000e+00> : vector<8x256xf32>
    %55 = tpu.matmul %54, %52, %cst_35 {dimension_numbers = #tpu.dot_dimension_numbers<[1], [0], [0], [1], [0, 0, 1, 1], [], []>} : vector<8x8xf32>, vector<8x256xf32>, vector<8x256xf32> -> vector<8x256xf32>
    %56 = arith.addf %51, %55 : vector<8x256xf32>
    %57 = vector.extract_strided_slice %2 {offsets = [0, 102], sizes = [8, 256], strides = [1, 1]} : vector<8x512xf32> to vector<8x256xf32>
    %c11 = arith.constant 11 : index
    %c0_36 = arith.constant 0 : index
    %c0_37 = arith.constant 0 : index
    %58 = vector.load %arg3[%c11, %c0_36, %c0_37] : memref<27x8x8xf32, #tpu.memory_space<vmem>>, vector<1x8x8xf32>
    %59 = vector.shape_cast %58 : vector<1x8x8xf32> to vector<8x8xf32>
    %cst_38 = arith.constant dense<0.000000e+00> : vector<8x256xf32>
    %60 = tpu.matmul %59, %57, %cst_38 {dimension_numbers = #tpu.dot_dimension_numbers<[1], [0], [0], [1], [0, 0, 1, 1], [], []>} : vector<8x8xf32>, vector<8x256xf32>, vector<8x256xf32> -> vector<8x256xf32>
    %61 = arith.addf %56, %60 : vector<8x256xf32>
    %62 = vector.extract_strided_slice %2 {offsets = [0, 110], sizes = [8, 256], strides = [1, 1]} : vector<8x512xf32> to vector<8x256xf32>
    %c12 = arith.constant 12 : index
    %c0_39 = arith.constant 0 : index
    %c0_40 = arith.constant 0 : index
    %63 = vector.load %arg3[%c12, %c0_39, %c0_40] : memref<27x8x8xf32, #tpu.memory_space<vmem>>, vector<1x8x8xf32>
    %64 = vector.shape_cast %63 : vector<1x8x8xf32> to vector<8x8xf32>
    %cst_41 = arith.constant dense<0.000000e+00> : vector<8x256xf32>
    %65 = tpu.matmul %64, %62, %cst_41 {dimension_numbers = #tpu.dot_dimension_numbers<[1], [0], [0], [1], [0, 0, 1, 1], [], []>} : vector<8x8xf32>, vector<8x256xf32>, vector<8x256xf32> -> vector<8x256xf32>
    %66 = arith.addf %61, %65 : vector<8x256xf32>
    %67 = vector.extract_strided_slice %2 {offsets = [0, 111], sizes = [8, 256], strides = [1, 1]} : vector<8x512xf32> to vector<8x256xf32>
    %c13 = arith.constant 13 : index
    %c0_42 = arith.constant 0 : index
    %c0_43 = arith.constant 0 : index
    %68 = vector.load %arg3[%c13, %c0_42, %c0_43] : memref<27x8x8xf32, #tpu.memory_space<vmem>>, vector<1x8x8xf32>
    %69 = vector.shape_cast %68 : vector<1x8x8xf32> to vector<8x8xf32>
    %cst_44 = arith.constant dense<0.000000e+00> : vector<8x256xf32>
    %70 = tpu.matmul %69, %67, %cst_44 {dimension_numbers = #tpu.dot_dimension_numbers<[1], [0], [0], [1], [0, 0, 1, 1], [], []>} : vector<8x8xf32>, vector<8x256xf32>, vector<8x256xf32> -> vector<8x256xf32>
    %71 = arith.addf %66, %70 : vector<8x256xf32>
    %72 = vector.extract_strided_slice %2 {offsets = [0, 112], sizes = [8, 256], strides = [1, 1]} : vector<8x512xf32> to vector<8x256xf32>
    %c14 = arith.constant 14 : index
    %c0_45 = arith.constant 0 : index
    %c0_46 = arith.constant 0 : index
    %73 = vector.load %arg3[%c14, %c0_45, %c0_46] : memref<27x8x8xf32, #tpu.memory_space<vmem>>, vector<1x8x8xf32>
    %74 = vector.shape_cast %73 : vector<1x8x8xf32> to vector<8x8xf32>
    %cst_47 = arith.constant dense<0.000000e+00> : vector<8x256xf32>
    %75 = tpu.matmul %74, %72, %cst_47 {dimension_numbers = #tpu.dot_dimension_numbers<[1], [0], [0], [1], [0, 0, 1, 1], [], []>} : vector<8x8xf32>, vector<8x256xf32>, vector<8x256xf32> -> vector<8x256xf32>
    %76 = arith.addf %71, %75 : vector<8x256xf32>
    %77 = vector.extract_strided_slice %2 {offsets = [0, 120], sizes = [8, 256], strides = [1, 1]} : vector<8x512xf32> to vector<8x256xf32>
    %c15 = arith.constant 15 : index
    %c0_48 = arith.constant 0 : index
    %c0_49 = arith.constant 0 : index
    %78 = vector.load %arg3[%c15, %c0_48, %c0_49] : memref<27x8x8xf32, #tpu.memory_space<vmem>>, vector<1x8x8xf32>
    %79 = vector.shape_cast %78 : vector<1x8x8xf32> to vector<8x8xf32>
    %cst_50 = arith.constant dense<0.000000e+00> : vector<8x256xf32>
    %80 = tpu.matmul %79, %77, %cst_50 {dimension_numbers = #tpu.dot_dimension_numbers<[1], [0], [0], [1], [0, 0, 1, 1], [], []>} : vector<8x8xf32>, vector<8x256xf32>, vector<8x256xf32> -> vector<8x256xf32>
    %81 = arith.addf %76, %80 : vector<8x256xf32>
    %82 = vector.extract_strided_slice %2 {offsets = [0, 121], sizes = [8, 256], strides = [1, 1]} : vector<8x512xf32> to vector<8x256xf32>
    %c16 = arith.constant 16 : index
    %c0_51 = arith.constant 0 : index
    %c0_52 = arith.constant 0 : index
    %83 = vector.load %arg3[%c16, %c0_51, %c0_52] : memref<27x8x8xf32, #tpu.memory_space<vmem>>, vector<1x8x8xf32>
    %84 = vector.shape_cast %83 : vector<1x8x8xf32> to vector<8x8xf32>
    %cst_53 = arith.constant dense<0.000000e+00> : vector<8x256xf32>
    %85 = tpu.matmul %84, %82, %cst_53 {dimension_numbers = #tpu.dot_dimension_numbers<[1], [0], [0], [1], [0, 0, 1, 1], [], []>} : vector<8x8xf32>, vector<8x256xf32>, vector<8x256xf32> -> vector<8x256xf32>
    %86 = arith.addf %81, %85 : vector<8x256xf32>
    %87 = vector.extract_strided_slice %2 {offsets = [0, 122], sizes = [8, 256], strides = [1, 1]} : vector<8x512xf32> to vector<8x256xf32>
    %c17 = arith.constant 17 : index
    %c0_54 = arith.constant 0 : index
    %c0_55 = arith.constant 0 : index
    %88 = vector.load %arg3[%c17, %c0_54, %c0_55] : memref<27x8x8xf32, #tpu.memory_space<vmem>>, vector<1x8x8xf32>
    %89 = vector.shape_cast %88 : vector<1x8x8xf32> to vector<8x8xf32>
    %cst_56 = arith.constant dense<0.000000e+00> : vector<8x256xf32>
    %90 = tpu.matmul %89, %87, %cst_56 {dimension_numbers = #tpu.dot_dimension_numbers<[1], [0], [0], [1], [0, 0, 1, 1], [], []>} : vector<8x8xf32>, vector<8x256xf32>, vector<8x256xf32> -> vector<8x256xf32>
    %91 = arith.addf %86, %90 : vector<8x256xf32>
    %92 = vector.extract_strided_slice %2 {offsets = [0, 200], sizes = [8, 256], strides = [1, 1]} : vector<8x512xf32> to vector<8x256xf32>
    %c18 = arith.constant 18 : index
    %c0_57 = arith.constant 0 : index
    %c0_58 = arith.constant 0 : index
    %93 = vector.load %arg3[%c18, %c0_57, %c0_58] : memref<27x8x8xf32, #tpu.memory_space<vmem>>, vector<1x8x8xf32>
    %94 = vector.shape_cast %93 : vector<1x8x8xf32> to vector<8x8xf32>
    %cst_59 = arith.constant dense<0.000000e+00> : vector<8x256xf32>
    %95 = tpu.matmul %94, %92, %cst_59 {dimension_numbers = #tpu.dot_dimension_numbers<[1], [0], [0], [1], [0, 0, 1, 1], [], []>} : vector<8x8xf32>, vector<8x256xf32>, vector<8x256xf32> -> vector<8x256xf32>
    %96 = arith.addf %91, %95 : vector<8x256xf32>
    %97 = vector.extract_strided_slice %2 {offsets = [0, 201], sizes = [8, 256], strides = [1, 1]} : vector<8x512xf32> to vector<8x256xf32>
    %c19 = arith.constant 19 : index
    %c0_60 = arith.constant 0 : index
    %c0_61 = arith.constant 0 : index
    %98 = vector.load %arg3[%c19, %c0_60, %c0_61] : memref<27x8x8xf32, #tpu.memory_space<vmem>>, vector<1x8x8xf32>
    %99 = vector.shape_cast %98 : vector<1x8x8xf32> to vector<8x8xf32>
    %cst_62 = arith.constant dense<0.000000e+00> : vector<8x256xf32>
    %100 = tpu.matmul %99, %97, %cst_62 {dimension_numbers = #tpu.dot_dimension_numbers<[1], [0], [0], [1], [0, 0, 1, 1], [], []>} : vector<8x8xf32>, vector<8x256xf32>, vector<8x256xf32> -> vector<8x256xf32>
    %101 = arith.addf %96, %100 : vector<8x256xf32>
    %102 = vector.extract_strided_slice %2 {offsets = [0, 202], sizes = [8, 256], strides = [1, 1]} : vector<8x512xf32> to vector<8x256xf32>
    %c20 = arith.constant 20 : index
    %c0_63 = arith.constant 0 : index
    %c0_64 = arith.constant 0 : index
    %103 = vector.load %arg3[%c20, %c0_63, %c0_64] : memref<27x8x8xf32, #tpu.memory_space<vmem>>, vector<1x8x8xf32>
    %104 = vector.shape_cast %103 : vector<1x8x8xf32> to vector<8x8xf32>
    %cst_65 = arith.constant dense<0.000000e+00> : vector<8x256xf32>
    %105 = tpu.matmul %104, %102, %cst_65 {dimension_numbers = #tpu.dot_dimension_numbers<[1], [0], [0], [1], [0, 0, 1, 1], [], []>} : vector<8x8xf32>, vector<8x256xf32>, vector<8x256xf32> -> vector<8x256xf32>
    %106 = arith.addf %101, %105 : vector<8x256xf32>
    %107 = vector.extract_strided_slice %2 {offsets = [0, 210], sizes = [8, 256], strides = [1, 1]} : vector<8x512xf32> to vector<8x256xf32>
    %c21 = arith.constant 21 : index
    %c0_66 = arith.constant 0 : index
    %c0_67 = arith.constant 0 : index
    %108 = vector.load %arg3[%c21, %c0_66, %c0_67] : memref<27x8x8xf32, #tpu.memory_space<vmem>>, vector<1x8x8xf32>
    %109 = vector.shape_cast %108 : vector<1x8x8xf32> to vector<8x8xf32>
    %cst_68 = arith.constant dense<0.000000e+00> : vector<8x256xf32>
    %110 = tpu.matmul %109, %107, %cst_68 {dimension_numbers = #tpu.dot_dimension_numbers<[1], [0], [0], [1], [0, 0, 1, 1], [], []>} : vector<8x8xf32>, vector<8x256xf32>, vector<8x256xf32> -> vector<8x256xf32>
    %111 = arith.addf %106, %110 : vector<8x256xf32>
    %112 = vector.extract_strided_slice %2 {offsets = [0, 211], sizes = [8, 256], strides = [1, 1]} : vector<8x512xf32> to vector<8x256xf32>
    %c22 = arith.constant 22 : index
    %c0_69 = arith.constant 0 : index
    %c0_70 = arith.constant 0 : index
    %113 = vector.load %arg3[%c22, %c0_69, %c0_70] : memref<27x8x8xf32, #tpu.memory_space<vmem>>, vector<1x8x8xf32>
    %114 = vector.shape_cast %113 : vector<1x8x8xf32> to vector<8x8xf32>
    %cst_71 = arith.constant dense<0.000000e+00> : vector<8x256xf32>
    %115 = tpu.matmul %114, %112, %cst_71 {dimension_numbers = #tpu.dot_dimension_numbers<[1], [0], [0], [1], [0, 0, 1, 1], [], []>} : vector<8x8xf32>, vector<8x256xf32>, vector<8x256xf32> -> vector<8x256xf32>
    %116 = arith.addf %111, %115 : vector<8x256xf32>
    %117 = vector.extract_strided_slice %2 {offsets = [0, 212], sizes = [8, 256], strides = [1, 1]} : vector<8x512xf32> to vector<8x256xf32>
    %c23 = arith.constant 23 : index
    %c0_72 = arith.constant 0 : index
    %c0_73 = arith.constant 0 : index
    %118 = vector.load %arg3[%c23, %c0_72, %c0_73] : memref<27x8x8xf32, #tpu.memory_space<vmem>>, vector<1x8x8xf32>
    %119 = vector.shape_cast %118 : vector<1x8x8xf32> to vector<8x8xf32>
    %cst_74 = arith.constant dense<0.000000e+00> : vector<8x256xf32>
    %120 = tpu.matmul %119, %117, %cst_74 {dimension_numbers = #tpu.dot_dimension_numbers<[1], [0], [0], [1], [0, 0, 1, 1], [], []>} : vector<8x8xf32>, vector<8x256xf32>, vector<8x256xf32> -> vector<8x256xf32>
    %121 = arith.addf %116, %120 : vector<8x256xf32>
    %122 = vector.extract_strided_slice %2 {offsets = [0, 220], sizes = [8, 256], strides = [1, 1]} : vector<8x512xf32> to vector<8x256xf32>
    %c24 = arith.constant 24 : index
    %c0_75 = arith.constant 0 : index
    %c0_76 = arith.constant 0 : index
    %123 = vector.load %arg3[%c24, %c0_75, %c0_76] : memref<27x8x8xf32, #tpu.memory_space<vmem>>, vector<1x8x8xf32>
    %124 = vector.shape_cast %123 : vector<1x8x8xf32> to vector<8x8xf32>
    %cst_77 = arith.constant dense<0.000000e+00> : vector<8x256xf32>
    %125 = tpu.matmul %124, %122, %cst_77 {dimension_numbers = #tpu.dot_dimension_numbers<[1], [0], [0], [1], [0, 0, 1, 1], [], []>} : vector<8x8xf32>, vector<8x256xf32>, vector<8x256xf32> -> vector<8x256xf32>
    %126 = arith.addf %121, %125 : vector<8x256xf32>
    %127 = vector.extract_strided_slice %2 {offsets = [0, 221], sizes = [8, 256], strides = [1, 1]} : vector<8x512xf32> to vector<8x256xf32>
    %c25 = arith.constant 25 : index
    %c0_78 = arith.constant 0 : index
    %c0_79 = arith.constant 0 : index
    %128 = vector.load %arg3[%c25, %c0_78, %c0_79] : memref<27x8x8xf32, #tpu.memory_space<vmem>>, vector<1x8x8xf32>
    %129 = vector.shape_cast %128 : vector<1x8x8xf32> to vector<8x8xf32>
    %cst_80 = arith.constant dense<0.000000e+00> : vector<8x256xf32>
    %130 = tpu.matmul %129, %127, %cst_80 {dimension_numbers = #tpu.dot_dimension_numbers<[1], [0], [0], [1], [0, 0, 1, 1], [], []>} : vector<8x8xf32>, vector<8x256xf32>, vector<8x256xf32> -> vector<8x256xf32>
    %131 = arith.addf %126, %130 : vector<8x256xf32>
    %132 = vector.extract_strided_slice %2 {offsets = [0, 222], sizes = [8, 256], strides = [1, 1]} : vector<8x512xf32> to vector<8x256xf32>
    %c26 = arith.constant 26 : index
    %c0_81 = arith.constant 0 : index
    %c0_82 = arith.constant 0 : index
    %133 = vector.load %arg3[%c26, %c0_81, %c0_82] : memref<27x8x8xf32, #tpu.memory_space<vmem>>, vector<1x8x8xf32>
    %134 = vector.shape_cast %133 : vector<1x8x8xf32> to vector<8x8xf32>
    %cst_83 = arith.constant dense<0.000000e+00> : vector<8x256xf32>
    %135 = tpu.matmul %134, %132, %cst_83 {dimension_numbers = #tpu.dot_dimension_numbers<[1], [0], [0], [1], [0, 0, 1, 1], [], []>} : vector<8x8xf32>, vector<8x256xf32>, vector<8x256xf32> -> vector<8x256xf32>
    %136 = arith.addf %131, %135 : vector<8x256xf32>
    %c0_84 = arith.constant 0 : index
    %c0_85 = arith.constant 0 : index
    %137 = vector.load %arg4[%c0_84, %c0_85] : memref<8x1xf32, #tpu.memory_space<vmem>>, vector<8x1xf32>
    %138 = vector.broadcast %137 : vector<8x1xf32> to vector<8x256xf32>
    %139 = arith.addf %136, %138 : vector<8x256xf32>
    %cst_86 = arith.constant 0.000000e+00 : f32
    %140 = vector.broadcast %cst_86 : f32 to vector<8x256xf32>
    %141 = arith.maximumf %139, %140 : vector<8x256xf32>
    %c0_87 = arith.constant 0 : index
    %c0_88 = arith.constant 0 : index
    %142 = vector.load %arg5[%c0_87, %c0_88] : memref<8x256xf32, #tpu.memory_space<vmem>>, vector<8x256xf32>
    tpu.vector_store %arg5[%c0_87, %c0_88], %141 {strides = array<i32>} : memref<8x256xf32, #tpu.memory_space<vmem>>, vector<8x256xf32>,
    return
  }
  func.func @transform_0(%arg0: i32) -> (i32, i32) {
    %c0_i32 = arith.constant 0 : i32
    %c0_i32_0 = arith.constant 0 : i32
    return %c0_i32, %arg0 : i32, i32
  }
  func.func @transform_1(%arg0: i32) -> (i32, i32) {
    %c1_i32 = arith.constant 1 : i32
    %0 = arith.addi %arg0, %c1_i32 : i32
    %c0_i32 = arith.constant 0 : i32
    %c0_i32_0 = arith.constant 0 : i32
    return %c0_i32, %0 : i32, i32
  }
  func.func @transform_2(%arg0: i32) -> (i32, i32, i32) {
    %c0_i32 = arith.constant 0 : i32
    %c0_i32_0 = arith.constant 0 : i32
    %c0_i32_1 = arith.constant 0 : i32
    %c0_i32_2 = arith.constant 0 : i32
    return %c0_i32, %c0_i32_0, %c0_i32_1 : i32, i32, i32
  }
  func.func @transform_3(%arg0: i32) -> (i32, i32) {
    %c0_i32 = arith.constant 0 : i32
    %c0_i32_0 = arith.constant 0 : i32
    %c0_i32_1 = arith.constant 0 : i32
    return %c0_i32, %c0_i32_0 : i32, i32
  }
  func.func @transform_4(%arg0: i32) -> (i32, i32) {
    %c0_i32 = arith.constant 0 : i32
    %c0_i32_0 = arith.constant 0 : i32
    return %c0_i32, %arg0 : i32, i32
  }
}

</mosaic_0001>

<bundles_post_ra>
// kernel: basic_convolution_block.1
= control target key start
LH: loop header
LB: loop body
LE: loop exit
PB: predicated region body
PF: predicated region fallthrough
CT: control target
= control target key end

     0   :  { %s2923_s15 = smov 0   ;;  %s3208_s0 = inlined_call_operand.vmem [shape: f32[8,2304], index: 0, kind: input, shape index: {}, may-alias: {0,1}]   ;;  %s3209_s1 = inlined_call_operand.vmem [shape: f32[8,2304], index: 1, kind: input, shape index: {}, may-alias: {0,1}]   ;;  %s3210_s2 = inlined_call_operand.vmem [shape: f32[27,8,8], index: 2, kind: input, shape index: {}]   ;;  %s3211_s3 = inlined_call_operand.vmem [shape: f32[8,1], index: 3, kind: input, shape index: {}]   ;;  %s3212_s4 = inlined_call_operand.vmem [shape: f32[8,2048], index: 4, kind: output, shape index: {}]  }
   0x1 LB: > { %s2705_s16 = sadd.s32 4294967295, %s2868_s15   ;;  %p2709_p0 = scmp.ge.s32.totalorder %s2868_s15, 1  ;;  %s2868_s15 = sphi %s2923_s15, %s14_s15  }
   0x2   : > { %p178_p1 = scmp.lt.s32.totalorder %s2868_s15, 9 }
   0x4   : > { %p179_p2 = pnand %p2709_p0, %p178_p1 }
   0x5   : > { %s2931_s17 = sshll.u32 (!%p179_p2), %s2705_s16, 1  ;;  %v2870_v2 = vmov (!%p179_p2), 0.0   ;;  %s2871_s28 = smov (!%p179_p2), 17   ;;  %vm1387_vm0 = vcmask (!%p179_p2), 138240   ;;  %vm251_vm1 = vcmask (!%p179_p2), 64512   ;;  %v2741_v10 = vld [vmem:[%s3210_s2 + $0x68] sm:$0xff] (!%p179_p2) }
   0x6   : > { %182 = sbr.rel (%p179_p2) target bundleno = 508 (0x1fc), region = 36  ;;  %p211_p3 = scmp.lt.s32.totalorder (!%p179_p2), %s2931_s17, 17  ;;  %1459 = vmatprep.mubr.f32.mxu0 (!%p179_p2), %v2870_v2  ;;  %319 = vmatprep.mubr.f32.mxu1 (!%p179_p2), %v2870_v2  ;;  %vm246_vm2 = vcmask (!%p179_p2), 1039360   ;;  %vm1476_vm3 = vcmask (!%p179_p2), 130048   ;;  %v2716_v19 = vld [vmem:[%s3210_s2 + $0x8] sm:$0xff] (!%p179_p2)  ;;  %v2743_v22 = vld [vmem:[%s3210_s2 + $0x70] sm:$0xff] (!%p179_p2) }
   0x7   : > { %s2772_s18 = sadd.s32 (!%p179_p2), 2, %s2931_s17  ;;  %s2872_s29 = smov (!%p179_p2), 127   ;;  %v234_v28 = vld [vmem:[%s3210_s2] sm:$0xff] (!%p179_p2)  ;;  %vm408_vm4 = vcmask (!%p179_p2), 1031168   ;;  %v2745_v31 = vld [vmem:[%s3210_s2 + $0x78] sm:$0xff] (!%p179_p2)  ;;  %vm1653_vm5 = vcmask (!%p179_p2), 56320  }
   0x8   : > { %p218_p4 = scmp.lt.s32.totalorder (!%p179_p2), %s2772_s18, 17  ;;  %s2873_s30 = smov (!%p179_p2), 16   ;;  %v2895_v36 = vmov (!%p179_p2), 0   ;;  %v2719_v41 = vld [vmem:[%s3210_s2 + $0x10] sm:$0xff] (!%p179_p2)  ;;  %v2747_v42 = vld [vmem:[%s3210_s2 + $0x80] sm:$0xff] (!%p179_p2)  ;;  %vm497_vm6 = vcmask (!%p179_p2), 965632  }
   0x9   : > { %s2874_s5 = smov (!%p179_p2), 8   ;;  %s2875_s6 = smov (!%p179_p2), 126   ;;  %2861 = vset.pattern.permute.xlu0 (!%p179_p2), %v2895_v36  ;;  %vm1742_vm7 = vcmask (!%p179_p2), 48128   ;;  %v2625_v46 = vld [vmem:[%s3211_s3] sm:$0xff] (!%p179_p2)  ;;  %v2721_v52 = vld [vmem:[%s3210_s2 + $0x18] sm:$0xff] (!%p179_p2)  ;;  %v2749_v53 = vld [vmem:[%s3210_s2 + $0x88] sm:$0xff] (!%p179_p2) }
   0xa   : > { %s2876_s7 = smov (!%p179_p2), 7   ;;  %s2877_s8 = smov (!%p179_p2), 118   ;;  %vm586_vm8 = vcmask (!%p179_p2), 957440   ;;  %vm1832_vm9 = vcmask (!%p179_p2), 457728   ;;  %vm675_vm10 = vcmask (!%p179_p2), 949248   ;;  %vm1921_vm11 = vcmask (!%p179_p2), 449536  }
   0xb   : > { %s2878_s9 = smov (!%p179_p2), 6   ;;  %s2879_s10 = smov (!%p179_p2), 117   ;;  %vm764_vm12 = vcmask (!%p179_p2), 883712   ;;  %vm2010_vm13 = vcmask (!%p179_p2), 441344   ;;  %vm853_vm14 = vcmask (!%p179_p2), 875520   ;;  %vm2099_vm15 = vcmask (!%p179_p2), 375808  }
   0xc   : > { %s2880_s11 = smov (!%p179_p2), 56   ;;  %s2881_s12 = smov (!%p179_p2), 116  }
   0xd   : > { %s212_s19 = scalar_select %p211_p3, %s2931_s17, 17 }
   0xe   : > { %s3214_s18 = smov (!%p218_p4, %s2772_s18), 17  ;;  %s2882_s13 = smov 55  }
   0xf   : > { %s2711_s20 = sshll.u32 %s212_s19, 3  ;;  %s2713_s24 = sshll.u32 %s3214_s18, 3 }
  0x10   : > { %s214_s23 = scalar_lea.vmem %s3208_s0, %s2711_s20  ;;  %s2946_s27 = scalar_lea.vmem %s3209_s1, %s2713_s24 }
  0x11   : > { %v2939_v0 = vld [vmem:[%s214_s23 + $0x8] sm:$0xff]  ;;  %v2941_v1 = vld [vmem:[%s214_s23] sm:$0xff]  ;;  %s2883_s14 = smov 108   ;;  %s2884_s16 = smov 54  }
  0x12   : > { %1383 = vrot.lane.b32.xlu0 %v2939_v0, %s2871_s28  ;;  %1381 = vrot.lane.b32.xlu1 %v2941_v1, %s2871_s28  ;;  %v2953_v3 = vld [vmem:[%s2946_s27] sm:$0xff]  ;;  %v2980_v4 = vld [vmem:[%s2946_s27 + $0x8] sm:$0xff]  ;;  %s2885_s18 = smov 107   ;;  %s2886_s19 = smov 46  }
  0x13   : > { %s2887_s20 = smov 106   ;;  %s2888_s21 = smov 45  }
  0x14   : > { %s2889_s22 = smov 28   ;;  %s2890_s23 = smov 44  }
  0x15   : > { %s2891_s26 = smov 27   ;;  %s2892_s27 = smov 36  }
  0x16   : > { %1385 = vrot.lane.b32.xlu0 %v2953_v3, %s2871_s28  ;;  %242 = vrot.lane.b32.xlu1 %v2939_v0, %s2872_s29  ;;  %p225_p5 = scmp.lt.s32.totalorder %s2931_s17, 15 }
  0x18   : > { %s3216_s17 = smov (!%p225_p5, %s2931_s17), 15 }
  0x1a   : > { %244 = vrot.lane.b32.xlu0 %v2953_v3, %s2872_s29  ;;  %1472 = vrot.lane.b32.xlu1 %v2939_v0, %s2873_s30 }
  0x1e   : > { %1474 = vrot.lane.b32.xlu0 %v2953_v3, %s2873_s30  ;;  %240 = vrot.lane.b32.xlu1 %v2941_v1, %s2872_s29 }
  0x22   : > { %1470 = vrot.lane.b32.xlu0 %v2941_v1, %s2873_s30  ;;  %1561 = vrot.lane.b32.xlu1 %v2939_v0, %s2874_s5 }
  0x26   : > { %1563 = vrot.lane.b32.xlu0 %v2953_v3, %s2874_s5  ;;  %1559 = vrot.lane.b32.xlu1 %v2941_v1, %s2874_s5 }
  0x2a   : > { %404 = vrot.lane.b32.xlu0 %v2939_v0, %s2875_s6  ;;  %406 = vrot.lane.b32.xlu1 %v2953_v3, %s2875_s6 }
  0x2e   : > { %1649 = vrot.lane.b32.xlu0 %v2939_v0, %s2876_s7  ;;  %1651 = vrot.lane.b32.xlu1 %v2953_v3, %s2876_s7 }
  0x32   : > { %402 = vrot.lane.b32.xlu0 %v2941_v1, %s2875_s6  ;;  %1647 = vrot.lane.b32.xlu1 %v2941_v1, %s2876_s7  ;;  %s2893_s6 = smov 26  }
  0x36   : > { %493 = vrot.lane.b32.xlu0 %v2939_v0, %s2877_s8  ;;  %495 = vrot.lane.b32.xlu1 %v2953_v3, %s2877_s8 }
  0x3a   : > { %1738 = vrot.lane.b32.xlu0 %v2939_v0, %s2878_s9  ;;  %1740 = vrot.lane.b32.xlu1 %v2953_v3, %s2878_s9 }
  0x3e   : > { %491 = vrot.lane.b32.xlu0 %v2941_v1, %s2877_s8  ;;  %1736 = vrot.lane.b32.xlu1 %v2941_v1, %s2878_s9  ;;  %s2894_s9 = smov 35  }
  0x42   : > { %582 = vrot.lane.b32.xlu0 %v2939_v0, %s2879_s10  ;;  %584 = vrot.lane.b32.xlu1 %v2953_v3, %s2879_s10 }
  0x46   : > { %1828 = vrot.lane.b32.xlu0 %v2953_v3, %s2880_s11  ;;  %1830 = vrot.lane.b32.xlu1 %v2980_v4, %s2880_s11 }
  0x4a   : > { %580 = vrot.lane.b32.xlu0 %v2941_v1, %s2879_s10  ;;  %1826 = vrot.lane.b32.xlu1 %v2939_v0, %s2880_s11 }
  0x4e   : > { %671 = vrot.lane.b32.xlu0 %v2939_v0, %s2881_s12  ;;  %673 = vrot.lane.b32.xlu1 %v2953_v3, %s2881_s12 }
  0x52   : > { %1917 = vrot.lane.b32.xlu0 %v2953_v3, %s2882_s13  ;;  %1919 = vrot.lane.b32.xlu1 %v2980_v4, %s2882_s13 }
  0x56   : > { %669 = vrot.lane.b32.xlu0 %v2941_v1, %s2881_s12  ;;  %1915 = vrot.lane.b32.xlu1 %v2939_v0, %s2882_s13  ;;  %s2896_s12 = smov 18  }
  0x5a   : > { %760 = vrot.lane.b32.xlu0 %v2939_v0, %s2883_s14  ;;  %762 = vrot.lane.b32.xlu1 %v2953_v3, %s2883_s14 }
  0x5e   : > { %2006 = vrot.lane.b32.xlu0 %v2953_v3, %s2884_s16  ;;  %2008 = vrot.lane.b32.xlu1 %v2980_v4, %s2884_s16 }
  0x62   : > { %758 = vrot.lane.b32.xlu0 %v2941_v1, %s2883_s14  ;;  %2004 = vrot.lane.b32.xlu1 %v2939_v0, %s2884_s16 }
  0x66   : > { %849 = vrot.lane.b32.xlu0 %v2939_v0, %s2885_s18  ;;  %851 = vrot.lane.b32.xlu1 %v2953_v3, %s2885_s18 }
  0x6a   : > { %2095 = vrot.lane.b32.xlu0 %v2953_v3, %s2886_s19  ;;  %2097 = vrot.lane.b32.xlu1 %v2980_v4, %s2886_s19 }
  0x6e   : > { %847 = vrot.lane.b32.xlu0 %v2941_v1, %s2885_s18  ;;  %2093 = vrot.lane.b32.xlu1 %v2939_v0, %s2886_s19  ;;  %s2897_s19 = smov 34  }
  0x72   : > { %938 = vrot.lane.b32.xlu0 %v2939_v0, %s2887_s20  ;;  %940 = vrot.lane.b32.xlu1 %v2953_v3, %s2887_s20 }
  0x76   : > { %2184 = vrot.lane.b32.xlu0 %v2953_v3, %s2888_s21  ;;  %2186 = vrot.lane.b32.xlu1 %v2980_v4, %s2888_s21 }
  0x7a   : > { %936 = vrot.lane.b32.xlu0 %v2941_v1, %s2887_s20  ;;  %2182 = vrot.lane.b32.xlu1 %v2939_v0, %s2888_s21 }
  0x7e   : > { %1027 = vrot.lane.b32.xlu0 %v2939_v0, %s2889_s22  ;;  %1029 = vrot.lane.b32.xlu1 %v2953_v3, %s2889_s22 }
  0x82   : > { %2273 = vrot.lane.b32.xlu0 %v2953_v3, %s2890_s23  ;;  %2275 = vrot.lane.b32.xlu1 %v2980_v4, %s2890_s23 }
  0x84   : > { %v1384_v5 = vpop.permute.xlu0 %1383  ;;  %v1382_v6 = vpop.permute.xlu1 %1381 }
  0x85   : > { %v1388_v11 = vsel %vm1387_vm0, %v1382_v6, %v1384_v5 }
  0x86   : > { %1025 = vrot.lane.b32.xlu0 %v2941_v1, %s2889_s22  ;;  %2271 = vrot.lane.b32.xlu1 %v2939_v0, %s2890_s23 }
  0x88   : > { %v1386_v7 = vpop.permute.xlu0 %1385  ;;  %v243_v8 = vpop.permute.xlu1 %242 }
  0x89   : > { %v1389_v9 = vsel %vm1387_vm0, %v1384_v5, %v1386_v7  ;;  %vm942_vm0 = vcmask 867328  }
  0x8a   : > { %1395 = vmatprep.subr.mxu0 %v1389_v9  ;;  %1116 = vrot.lane.b32.xlu0 %v2939_v0, %s2891_s26 }
  0x8b   : > { %1118 = vrot.lane.b32.xlu1 %v2953_v3, %s2891_s26  ;;  %1396 = vmatpush1.msra.mxu0 %v1388_v11 }
  0x8c   : > { %v245_v12 = vpop.permute.xlu0 %244  ;;  %v1473_v13 = vpop.permute.xlu1 %1472  ;;  %2742 = vmatmul.mubr.msk.f32.vlgmr.msra.gmra.mrb[0].mxu0 %vm251_vm1, %v2741_v10 }
  0x8d   : > { %v248_v14 = vsel %vm246_vm2, %v243_v8, %v245_v12  ;;  %1548 = vmatprep.mubr.f32.mxu0 %v2870_v2 }
  0x8e   : > { %2362 = vrot.lane.b32.xlu0 %v2953_v3, %s2892_s27  ;;  %255 = vmatprep.subr.mxu1 %v248_v14  ;;  %v2753_v14 = vld [vmem:[%s3210_s2 + $0x98] sm:$0xff] }
  0x8f   : > { %2364 = vrot.lane.b32.xlu1 %v2980_v4, %s2892_s27 }
  0x90   : > { %v1475_v15 = vpop.permute.xlu0 %1474  ;;  %v241_v16 = vpop.permute.xlu1 %240 }
  0x91   : > { %v247_v17 = vsel %vm246_vm2, %v241_v16, %v243_v8  ;;  %v1478_v18 = vsel %vm1476_vm3, %v1473_v13, %v1475_v15  ;;  %vm2188_vm2 = vcmask 367616  }
  0x92   : > { %1114 = vrot.lane.b32.xlu0 %v2941_v1, %s2891_s26  ;;  %256 = vmatpush1.msra.mxu1 %v247_v17 }
  0x93   : > { %2360 = vrot.lane.b32.xlu1 %v2939_v0, %s2892_s27  ;;  %1484 = vmatprep.subr.mxu0 %v1478_v18 }
  0x94   : > { %v1471_v20 = vpop.permute.xlu0 %1470  ;;  %v1562_v21 = vpop.permute.xlu1 %1561  ;;  %329 = vmatprep.subr.mxu1 %v2939_v0  ;;  %2717 = vmatmul.mubr.msk.f32.vlgmr.msra.gmra.mrb[0].mxu1 %vm251_vm1, %v2716_v19 }
  0x95   : > { %v1477_v23 = vsel %vm1476_vm3, %v1471_v20, %v1473_v13  ;;  %330 = vmatpush1.msra.mxu1 %v2941_v1  ;;  %393 = vmatprep.mubr.f32.mxu1 %v2870_v2  ;;  %v2725_v13 = vld [vmem:[%s3210_s2 + $0x28] sm:$0xff]  ;;  %vm1031_vm3 = vcmask 228352  }
  0x96   : > { %1205 = vrot.lane.b32.xlu0 %v2939_v0, %s2893_s6  ;;  %1485 = vmatpush1.msra.mxu0 %v1477_v23 }
  0x97   : > { %1207 = vrot.lane.b32.xlu1 %v2953_v3, %s2893_s6  ;;  %2744 = vmatmul.mubr.msk.f32.vlgmr.msra.gmra.mrb[0].mxu0 %vm251_vm1, %v2743_v22 }
  0x98   : > { %v1564_v24 = vpop.permute.xlu0 %1563  ;;  %v1560_v25 = vpop.permute.xlu1 %1559  ;;  %1636 = vmatprep.mubr.f32.mxu0 %v2870_v2 }
  0x99   : > { %v1565_v26 = vsel %vm251_vm1, %v1560_v25, %v1562_v21  ;;  %v1566_v27 = vsel %vm251_vm1, %v1562_v21, %v1564_v24  ;;  %v2727_v25 = vld [vmem:[%s3210_s2 + $0x30] sm:$0xff] }
  0x9a   : > { %2451 = vrot.lane.b32.xlu0 %v2953_v3, %s2894_s9  ;;  %1572 = vmatprep.subr.mxu0 %v1566_v27 }
  0x9b   : > { %2453 = vrot.lane.b32.xlu1 %v2980_v4, %s2894_s9  ;;  %1573 = vmatpush1.msra.mxu0 %v1565_v26  ;;  %v2755_v26 = vld [vmem:[%s3210_s2 + $0xa0] sm:$0xff] }
  0x9c   : > { %v405_v29 = vpop.permute.xlu0 %404  ;;  %v407_v30 = vpop.permute.xlu1 %406  ;;  %2718 = vmatmul.mubr.msk.f32.vlgmr.msra.gmra.mrb[0].mxu1 %vm251_vm1, %v234_v28 }
  0x9d   : > { %v410_v32 = vsel %vm408_vm4, %v405_v29, %v407_v30  ;;  %480 = vmatprep.mubr.f32.mxu1 %v2870_v2 }
  0x9e   : > { %1203 = vrot.lane.b32.xlu0 %v2941_v1, %s2893_s6  ;;  %416 = vmatprep.subr.mxu1 %v410_v32 }
  0x9f   : > { %2449 = vrot.lane.b32.xlu1 %v2939_v0, %s2894_s9  ;;  %2746 = vmatmul.mubr.msk.f32.vlgmr.msra.gmra.mrb[0].mxu0 %vm251_vm1, %v2745_v31 }
  0xa0   : > { %v1650_v33 = vpop.permute.xlu0 %1649  ;;  %v1652_v34 = vpop.permute.xlu1 %1651  ;;  %1725 = vmatprep.mubr.f32.mxu0 %v2870_v2 }
  0xa1   : > { %v1655_v35 = vsel %vm1653_vm5, %v1650_v33, %v1652_v34 }
  0xa2   : > { %1294 = vrot.lane.b32.xlu0 %v2939_v0, %s2896_s12  ;;  %1661 = vmatprep.subr.mxu0 %v1655_v35 }
  0xa3   : > { %1296 = vrot.lane.b32.xlu1 %v2953_v3, %s2896_s12 }
  0xa4   : > { %v403_v37 = vpop.permute.xlu0 %402  ;;  %v1648_v38 = vpop.permute.xlu1 %1647 }
  0xa5   : > { %v409_v39 = vsel %vm408_vm4, %v403_v37, %v405_v29  ;;  %v1654_v40 = vsel %vm1653_vm5, %v1648_v38, %v1650_v33  ;;  %v2729_v37 = vld [vmem:[%s3210_s2 + $0x38] sm:$0xff]  ;;  %v2757_v38 = vld [vmem:[%s3210_s2 + $0xa8] sm:$0xff]  ;;  %vm2277_vm4 = vcmask 359424   ;;  %vm1120_vm5 = vcmask 220160  }
  0xa6   : > { %2540 = vrot.lane.b32.xlu0 %v2953_v3, %s2897_s19  ;;  %417 = vmatpush1.msra.mxu1 %v409_v39 }
  0xa7   : > { %2542 = vrot.lane.b32.xlu1 %v2980_v4, %s2897_s19  ;;  %1662 = vmatpush1.msra.mxu0 %v1654_v40 }
  0xa8   : > { %v494_v43 = vpop.permute.xlu0 %493  ;;  %v496_v44 = vpop.permute.xlu1 %495  ;;  %2720 = vmatmul.mubr.msk.f32.vlgmr.msra.gmra.mrb[0].mxu1 %vm251_vm1, %v2719_v41  ;;  %2748 = vmatmul.mubr.msk.f32.vlgmr.msra.gmra.mrb[0].mxu0 %vm251_vm1, %v2747_v42 }
  0xa9   : > { %v499_v45 = vsel %vm497_vm6, %v494_v43, %v496_v44  ;;  %569 = vmatprep.mubr.f32.mxu1 %v2870_v2  ;;  %1814 = vmatprep.mubr.f32.mxu0 %v2870_v2 }
  0xaa   : > { %1292 = vrot.lane.b32.xlu0 %v2941_v1, %s2896_s12  ;;  %505 = vmatprep.subr.mxu1 %v499_v45  ;;  %v2751_v1 = vld [vmem:[%s3210_s2 + $0x90] sm:$0xff]  ;;  %s2715_s12 = sshll.u32 %s3216_s17, 3 }
  0xab   : > { %2538 = vrot.lane.b32.xlu1 %v2939_v0, %s2897_s19  ;;  %v2723_v0 = vld [vmem:[%s3210_s2 + $0x20] sm:$0xff]  ;;  %s228_s16 = scalar_lea.vmem %s3212_s4, %s2715_s12 }
  0xac   : > { %v1739_v47 = vpop.permute.xlu0 %1738  ;;  %v1741_v48 = vpop.permute.xlu1 %1740 }
  0xad   : > { %v1744_v49 = vsel %vm1742_vm7, %v1739_v47, %v1741_v48 }
  0xae   : > { %1750 = vmatprep.subr.mxu0 %v1744_v49  ;;  %2628 = vperm.xlu0 %2861, %v2625_v46   ;;  %v2731_v49 = vld [vmem:[%s3210_s2 + $0x40] sm:$0xff] }
  0xb0   : > { %v492_v50 = vpop.permute.xlu0 %491  ;;  %v1737_v51 = vpop.permute.xlu1 %1736 }
  0xb1   : > { %v498_v54 = vsel %vm497_vm6, %v492_v50, %v494_v43  ;;  %v1743_v55 = vsel %vm1742_vm7, %v1737_v51, %v1739_v47  ;;  %v2759_v50 = vld [vmem:[%s3210_s2 + $0xb0] sm:$0xff]  ;;  %vm2366_vm6 = vcmask 293888   ;;  %vm1209_vm7 = vcmask 211968  }
  0xb2   : > { %506 = vmatpush1.msra.mxu1 %v498_v54  ;;  %1751 = vmatpush1.msra.mxu0 %v1743_v55 }
  0xb3   : > { %2722 = vmatmul.mubr.msk.f32.vlgmr.msra.gmra.mrb[0].mxu1 %vm251_vm1, %v2721_v52  ;;  %2750 = vmatmul.mubr.msk.f32.vlgmr.msra.gmra.mrb[0].mxu0 %vm251_vm1, %v2749_v53 }
  0xb4   : > { %v583_v56 = vpop.permute.xlu0 %582  ;;  %v585_v57 = vpop.permute.xlu1 %584  ;;  %658 = vmatprep.mubr.f32.mxu1 %v2870_v2  ;;  %1904 = vmatprep.mubr.f32.mxu0 %v2870_v2 }
  0xb5   : > { %v588_v58 = vsel %vm586_vm8, %v583_v56, %v585_v57 }
  0xb6   : > { %594 = vmatprep.subr.mxu1 %v588_v58 }
  0xb8   : > { %v1829_v59 = vpop.permute.xlu0 %1828  ;;  %v1831_v60 = vpop.permute.xlu1 %1830 }
  0xb9   : > { %v1834_v61 = vsel %vm1832_vm9, %v1829_v59, %v1831_v60 }
  0xba   : > { %1840 = vmatprep.subr.mxu0 %v1834_v61  ;;  %v2733_v61 = vld [vmem:[%s3210_s2 + $0x48] sm:$0xff] }
  0xbc   : > { %v581_v62 = vpop.permute.xlu0 %580  ;;  %v1827_v63 = vpop.permute.xlu1 %1826 }
  0xbd   : > { %v587_v3 = vsel %vm586_vm8, %v581_v62, %v583_v56  ;;  %v1833_v4 = vsel %vm1832_vm9, %v1827_v63, %v1829_v59  ;;  %v2761_v62 = vld [vmem:[%s3210_s2 + $0xb8] sm:$0xff]  ;;  %vm2455_vm8 = vcmask 285696   ;;  %vm1298_vm9 = vcmask 146432  }
  0xbe   : > { %595 = vmatpush1.msra.mxu1 %v587_v3  ;;  %1841 = vmatpush1.msra.mxu0 %v1833_v4 }
  0xbf   : > { %2724 = vmatmul.mubr.msk.f32.vlgmr.msra.gmra.mrb[0].mxu1 %vm251_vm1, %v2723_v0  ;;  %2752 = vmatmul.mubr.msk.f32.vlgmr.msra.gmra.mrb[0].mxu0 %vm251_vm1, %v2751_v1 }
  0xc0   : > { %v672_v5 = vpop.permute.xlu0 %671  ;;  %v674_v6 = vpop.permute.xlu1 %673  ;;  %747 = vmatprep.mubr.f32.mxu1 %v2870_v2  ;;  %1993 = vmatprep.mubr.f32.mxu0 %v2870_v2 }
  0xc1   : > { %v677_v7 = vsel %vm675_vm10, %v672_v5, %v674_v6 }
  0xc2   : > { %683 = vmatprep.subr.mxu1 %v677_v7 }
  0xc4   : > { %v1918_v8 = vpop.permute.xlu0 %1917  ;;  %v1920_v9 = vpop.permute.xlu1 %1919 }
  0xc5   : > { %v1923_v10 = vsel %vm1921_vm11, %v1918_v8, %v1920_v9  ;;  %v2735_v9 = vld [vmem:[%s3210_s2 + $0x50] sm:$0xff] }
  0xc6   : > { %1929 = vmatprep.subr.mxu0 %v1923_v10 }
  0xc8   : > { %v670_v11 = vpop.permute.xlu0 %669  ;;  %v1916_v12 = vpop.permute.xlu1 %1915 }
  0xc9   : > { %v676_v15 = vsel %vm675_vm10, %v670_v11, %v672_v5  ;;  %v1922_v16 = vsel %vm1921_vm11, %v1916_v12, %v1918_v8  ;;  %v2763_v12 = vld [vmem:[%s3210_s2 + $0xc0] sm:$0xff]  ;;  %vm2544_vm10 = vcmask 277504  }
  0xca   : > { %684 = vmatpush1.msra.mxu1 %v676_v15  ;;  %1930 = vmatpush1.msra.mxu0 %v1922_v16 }
  0xcb   : > { %2726 = vmatmul.mubr.msk.f32.vlgmr.msra.gmra.mrb[0].mxu1 %vm251_vm1, %v2725_v13  ;;  %2754 = vmatmul.mubr.msk.f32.vlgmr.msra.gmra.mrb[0].mxu0 %vm251_vm1, %v2753_v14 }
  0xcc   : > { %v761_v17 = vpop.permute.xlu0 %760  ;;  %v763_v18 = vpop.permute.xlu1 %762  ;;  %836 = vmatprep.mubr.f32.mxu1 %v2870_v2  ;;  %2082 = vmatprep.mubr.f32.mxu0 %v2870_v2 }
  0xcd   : > { %v766_v19 = vsel %vm764_vm12, %v761_v17, %v763_v18 }
  0xce   : > { %772 = vmatprep.subr.mxu1 %v766_v19 }
  0xd0   : > { %v2007_v20 = vpop.permute.xlu0 %2006  ;;  %v2009_v21 = vpop.permute.xlu1 %2008 }
  0xd1   : > { %v2012_v22 = vsel %vm2010_vm13, %v2007_v20, %v2009_v21  ;;  %v2737_v21 = vld [vmem:[%s3210_s2 + $0x58] sm:$0xff] }
  0xd2   : > { %2018 = vmatprep.subr.mxu0 %v2012_v22 }
  0xd4   : > { %v759_v23 = vpop.permute.xlu0 %758  ;;  %v2005_v24 = vpop.permute.xlu1 %2004 }
  0xd5   : > { %v765_v27 = vsel %vm764_vm12, %v759_v23, %v761_v17  ;;  %v2011_v28 = vsel %vm2010_vm13, %v2005_v24, %v2007_v20  ;;  %v2765_v24 = vld [vmem:[%s3210_s2 + $0xc8] sm:$0xff] }
  0xd6   : > { %773 = vmatpush1.msra.mxu1 %v765_v27  ;;  %2019 = vmatpush1.msra.mxu0 %v2011_v28 }
  0xd7   : > { %2728 = vmatmul.mubr.msk.f32.vlgmr.msra.gmra.mrb[0].mxu1 %vm251_vm1, %v2727_v25  ;;  %2756 = vmatmul.mubr.msk.f32.vlgmr.msra.gmra.mrb[0].mxu0 %vm251_vm1, %v2755_v26 }
  0xd8   : > { %v850_v29 = vpop.permute.xlu0 %849  ;;  %v852_v30 = vpop.permute.xlu1 %851  ;;  %925 = vmatprep.mubr.f32.mxu1 %v2870_v2  ;;  %2171 = vmatprep.mubr.f32.mxu0 %v2870_v2 }
  0xd9   : > { %v855_v31 = vsel %vm853_vm14, %v850_v29, %v852_v30 }
  0xda   : > { %861 = vmatprep.subr.mxu1 %v855_v31 }
  0xdc   : > { %v2096_v32 = vpop.permute.xlu0 %2095  ;;  %v2098_v33 = vpop.permute.xlu1 %2097 }
  0xdd   : > { %v2101_v34 = vsel %vm2099_vm15, %v2096_v32, %v2098_v33  ;;  %v2739_v33 = vld [vmem:[%s3210_s2 + $0x60] sm:$0xff] }
  0xde   : > { %2107 = vmatprep.subr.mxu0 %v2101_v34 }
  0xe0   : > { %v848_v35 = vpop.permute.xlu0 %847  ;;  %v2094_v36 = vpop.permute.xlu1 %2093 }
  0xe1   : > { %v854_v39 = vsel %vm853_vm14, %v848_v35, %v850_v29  ;;  %v2100_v40 = vsel %vm2099_vm15, %v2094_v36, %v2096_v32 }
  0xe2   : > { %862 = vmatpush1.msra.mxu1 %v854_v39  ;;  %2108 = vmatpush1.msra.mxu0 %v2100_v40 }
  0xe3   : > { %2730 = vmatmul.mubr.msk.f32.vlgmr.msra.gmra.mrb[0].mxu1 %vm251_vm1, %v2729_v37  ;;  %2758 = vmatmul.mubr.msk.f32.vlgmr.msra.gmra.mrb[0].mxu0 %vm251_vm1, %v2757_v38 }
  0xe4   : > { %v939_v41 = vpop.permute.xlu0 %938  ;;  %v941_v42 = vpop.permute.xlu1 %940  ;;  %1014 = vmatprep.mubr.f32.mxu1 %v2870_v2  ;;  %2260 = vmatprep.mubr.f32.mxu0 %v2870_v2 }
  0xe5   : > { %v944_v43 = vsel %vm942_vm0, %v939_v41, %v941_v42 }
  0xe6   : > { %950 = vmatprep.subr.mxu1 %v944_v43 }
  0xe8   : > { %v2185_v44 = vpop.permute.xlu0 %2184  ;;  %v2187_v45 = vpop.permute.xlu1 %2186 }
  0xe9   : > { %v2190_v46 = vsel %vm2188_vm2, %v2185_v44, %v2187_v45 }
  0xea   : > { %2196 = vmatprep.subr.mxu0 %v2190_v46 }
  0xec   : > { %v937_v47 = vpop.permute.xlu0 %936  ;;  %v2183_v48 = vpop.permute.xlu1 %2182 }
  0xed   : > { %v943_v51 = vsel %vm942_vm0, %v937_v47, %v939_v41  ;;  %v2189_v52 = vsel %vm2188_vm2, %v2183_v48, %v2185_v44 }
  0xee   : > { %951 = vmatpush1.msra.mxu1 %v943_v51  ;;  %2197 = vmatpush1.msra.mxu0 %v2189_v52 }
  0xef   : > { %2732 = vmatmul.mubr.msk.f32.vlgmr.msra.gmra.mrb[0].mxu1 %vm251_vm1, %v2731_v49  ;;  %2760 = vmatmul.mubr.msk.f32.vlgmr.msra.gmra.mrb[0].mxu0 %vm251_vm1, %v2759_v50 }
  0xf0   : > { %v1028_v53 = vpop.permute.xlu0 %1027  ;;  %v1030_v54 = vpop.permute.xlu1 %1029  ;;  %1103 = vmatprep.mubr.f32.mxu1 %v2870_v2  ;;  %2349 = vmatprep.mubr.f32.mxu0 %v2870_v2 }
  0xf1   : > { %v1033_v55 = vsel %vm1031_vm3, %v1028_v53, %v1030_v54 }
  0xf2   : > { %1039 = vmatprep.subr.mxu1 %v1033_v55 }
  0xf4   : > { %v2274_v56 = vpop.permute.xlu0 %2273  ;;  %v2276_v57 = vpop.permute.xlu1 %2275 }
  0xf5   : > { %v2279_v58 = vsel %vm2277_vm4, %v2274_v56, %v2276_v57 }
  0xf6   : > { %2285 = vmatprep.subr.mxu0 %v2279_v58 }
  0xf8   : > { %v1026_v59 = vpop.permute.xlu0 %1025  ;;  %v2272_v60 = vpop.permute.xlu1 %2271 }
  0xf9   : > { %v1032_v63 = vsel %vm1031_vm3, %v1026_v59, %v1028_v53  ;;  %v2278_v0 = vsel %vm2277_vm4, %v2272_v60, %v2274_v56 }
  0xfa   : > { %1040 = vmatpush1.msra.mxu1 %v1032_v63  ;;  %2286 = vmatpush1.msra.mxu0 %v2278_v0 }
  0xfb   : > { %2734 = vmatmul.mubr.msk.f32.vlgmr.msra.gmra.mrb[0].mxu1 %vm251_vm1, %v2733_v61  ;;  %2762 = vmatmul.mubr.msk.f32.vlgmr.msra.gmra.mrb[0].mxu0 %vm251_vm1, %v2761_v62 }
  0xfc   : > { %v1117_v1 = vpop.permute.xlu0 %1116  ;;  %1192 = vmatprep.mubr.f32.mxu1 %v2870_v2  ;;  %2438 = vmatprep.mubr.f32.mxu0 %v2870_v2 }
  0xfd   : > { %v1119_v3 = vpop.permute.xlu1 %1118 }
  0xfe   : > { %v1122_v4 = vsel %vm1120_vm5, %v1117_v1, %v1119_v3 }
  0xff   : > { %1128 = vmatprep.subr.mxu1 %v1122_v4 }
 0x100   : > { %v2363_v5 = vpop.permute.xlu0 %2362 }
 0x101   : > { %v2365_v6 = vpop.permute.xlu1 %2364 }
 0x102   : > { %v2368_v7 = vsel %vm2366_vm6, %v2363_v5, %v2365_v6 }
 0x103   : > { %2374 = vmatprep.subr.mxu0 %v2368_v7 }
 0x104   : > { %v1115_v8 = vpop.permute.xlu0 %1114 }
 0x105   : > { %v1121_v10 = vsel %vm1120_vm5, %v1115_v8, %v1117_v1  ;;  %v2361_v11 = vpop.permute.xlu1 %2360 }
 0x106   : > { %v2367_v13 = vsel %vm2366_vm6, %v2361_v11, %v2363_v5  ;;  %1129 = vmatpush1.msra.mxu1 %v1121_v10 }
 0x107   : > { %2375 = vmatpush1.msra.mxu0 %v2367_v13  ;;  %2736 = vmatmul.mubr.msk.f32.vlgmr.msra.gmra.mrb[0].mxu1 %vm251_vm1, %v2735_v9 }
 0x108   : > { %v1206_v14 = vpop.permute.xlu0 %1205  ;;  %2764 = vmatmul.mubr.msk.f32.vlgmr.msra.gmra.mrb[0].mxu0 %vm251_vm1, %v2763_v12  ;;  %1281 = vmatprep.mubr.f32.mxu1 %v2870_v2 }
 0x109   : > { %v1208_v15 = vpop.permute.xlu1 %1207  ;;  %2527 = vmatprep.mubr.f32.mxu0 %v2870_v2 }
 0x10a   : > { %v1211_v16 = vsel %vm1209_vm7, %v1206_v14, %v1208_v15 }
 0x10b   : > { %1217 = vmatprep.subr.mxu1 %v1211_v16 }
 0x10c   : > { %v2452_v17 = vpop.permute.xlu0 %2451 }
 0x10d   : > { %v2454_v18 = vpop.permute.xlu1 %2453 }
 0x10e   : > { %v2457_v19 = vsel %vm2455_vm8, %v2452_v17, %v2454_v18 }
 0x10f   : > { %2463 = vmatprep.subr.mxu0 %v2457_v19 }
 0x110   : > { %v1204_v20 = vpop.permute.xlu0 %1203 }
 0x111   : > { %v1210_v22 = vsel %vm1209_vm7, %v1204_v20, %v1206_v14  ;;  %v2450_v23 = vpop.permute.xlu1 %2449 }
 0x112   : > { %v2456_v25 = vsel %vm2455_vm8, %v2450_v23, %v2452_v17  ;;  %1218 = vmatpush1.msra.mxu1 %v1210_v22 }
 0x113   : > { %2464 = vmatpush1.msra.mxu0 %v2456_v25  ;;  %2738 = vmatmul.mubr.msk.f32.vlgmr.msra.gmra.mrb[0].mxu1 %vm251_vm1, %v2737_v21 }
 0x114   : > { %v1295_v26 = vpop.permute.xlu0 %1294  ;;  %2766 = vmatmul.mubr.msk.f32.vlgmr.msra.gmra.mrb[0].mxu0 %vm251_vm1, %v2765_v24  ;;  %1370 = vmatprep.mubr.f32.mxu1 %v2870_v2 }
 0x115   : > { %v1297_v27 = vpop.permute.xlu1 %1296  ;;  %2616 = vmatprep.mubr.f32.mxu0 %v2870_v2  ;;  %v2767_v2 = vld [vmem:[%s3210_s2 + $0xd0] sm:$0xff] }
 0x116   : > { %v1300_v28 = vsel %vm1298_vm9, %v1295_v26, %v1297_v27 }
 0x117   : > { %1306 = vmatprep.subr.mxu1 %v1300_v28 }
 0x118   : > { %v2541_v29 = vpop.permute.xlu0 %2540 }
 0x119   : > { %v2543_v30 = vpop.permute.xlu1 %2542 }
 0x11a   : > { %v2546_v31 = vsel %vm2544_vm10, %v2541_v29, %v2543_v30 }
 0x11b   : > { %2552 = vmatprep.subr.mxu0 %v2546_v31 }
 0x11c   : > { %v1293_v32 = vpop.permute.xlu0 %1292 }
 0x11d   : > { %v1299_v34 = vsel %vm1298_vm9, %v1293_v32, %v1295_v26  ;;  %v2539_v35 = vpop.permute.xlu1 %2538 }
 0x11e   : > { %v2545_v36 = vsel %vm2544_vm10, %v2539_v35, %v2541_v29  ;;  %1307 = vmatpush1.msra.mxu1 %v1299_v34 }
 0x11f   : > { %2553 = vmatpush1.msra.mxu0 %v2545_v36  ;;  %2740 = vmatmul.mubr.msk.f32.vlgmr.msra.gmra.mrb[0].mxu1 %vm251_vm1, %v2739_v33 }
 0x120   : > { %2768 = vmatmul.mubr.msk.f32.vlgmr.msra.gmra.mrb[0].mxu0 %vm251_vm1, %v2767_v2 }
 0x12d   : > { %v2629_v38 = vpop.permute.xlu0 %2628 }
 0x1f2   : > { %v1372_v37 = vpop.f32.mrb[0].mxu1 }
 0x1f3   : > { %v2618_v39 = vpop.f32.mrb[0].mxu0  ;;  %v1374_v40 = vpop.f32.mrb[1].mxu1 }
 0x1f4   : > { %v2773_v41 = vadd.f32 %v2618_v39, %v1372_v37  ;;  %v2620_v42 = vpop.f32.mrb[1].mxu0 }
 0x1f5   : > { %v2774_v43 = vadd.f32 %v2620_v42, %v1374_v40 }
 0x1f6   : > { %v2631_v44 = vadd.f32 %v2773_v41, %v2629_v38 }
 0x1f7   : > { %v2632_v45 = vadd.f32 %v2774_v43, %v2629_v38 }
 0x1f8   : > { %v2633_v46 = vmax.f32 %v2631_v44, 0.0 }
 0x1f9   : > { %v2634_v47 = vmax.f32 %v2632_v45, 0.0 }
 0x1fa   : > { %2635 = vst [vmem:[%s228_s16] sm:$0xff] %v2633_v46 }
 0x1fb   : > { %2636 = vst [vmem:[%s228_s16 + $0x8] sm:$0xff] %v2634_v47 }
 0x1fc PF: > { %s14_s15 = sadd.s32 1, %s2868_s15  }
 0x1fd   : > { %p11_p6 = scmp.ge.s32.totalorder %s14_s15, 10  }
 0x1ff   :  { %13 = sbr.rel (!%p11_p6) target bundleno = 1 (0x1), region = 95 }

</bundles_post_ra>
